<compile_context>
chip_gen: v5e
topology: v5e:2x2
jax: 0.10.0
libtpu: 0.0.40
codegen_flags: <defaults>
</compile_context>

<pallas_src>
import math

import jax
import jax.numpy as jnp
from jax.experimental import pallas as pl
from jax.experimental.pallas import tpu as pltpu


# ---------------------------------------------------------------------------
# Kernels
# ---------------------------------------------------------------------------
def _fr_kernel_f32_out(x_ref, wt_ref, b_ref, o_ref):
    """f32 output: accumulate directly into the resident output block."""
    k = pl.program_id(2)

    @pl.when(k == 0)
    def _():
        o_ref[...] = jnp.zeros_like(o_ref)

    # Weights are stored pre-masked and pre-transposed (K, N): plain MXU dot.
    o_ref[...] += jnp.dot(x_ref[...], wt_ref[...],
                          preferred_element_type=jnp.float32)

    @pl.when(k == pl.num_programs(2) - 1)
    def _():
        o_ref[...] += b_ref[...]            # (1, tn) broadcasts over (tm, tn)


def _fr_kernel_acc(x_ref, wt_ref, b_ref, o_ref, acc_ref):
    """Non-f32 output: keep an f32 accumulator, cast once on writeback."""
    k = pl.program_id(2)

    @pl.when(k == 0)
    def _():
        acc_ref[...] = jnp.zeros_like(acc_ref)

    acc_ref[...] += jnp.dot(x_ref[...], wt_ref[...],
                            preferred_element_type=jnp.float32)

    @pl.when(k == pl.num_programs(2) - 1)
    def _():
        o_ref[...] = (acc_ref[...] + b_ref[...]).astype(o_ref.dtype)


# ---------------------------------------------------------------------------
# Tiling helpers
# ---------------------------------------------------------------------------
def _round_up(x, m):
    return ((x + m - 1) // m) * m


def _largest_tile(padded, grain, cap):
    """Largest multiple of `grain` that divides `padded` and is <= cap."""
    best = grain
    t = grain
    limit = min(padded, cap)
    while t <= limit:
        if padded % t == 0:
            best = t
        t += grain
    return best


def _choose_tiles(B, Dp):
    # Rows: pad only to the sublane grain (8); tile = largest divisor <= 512.
    Mp = _round_up(B, 8)
    tm = _largest_tile(Mp, 8, 512)
    # K (contraction): serial axis, big tiles are fine.
    tk = _largest_tile(Dp, 128, 512)
    # N (output features): cap at Dp/2 when possible so the "parallel" N axis
    # has >= 2 tiles and v7x's two TensorCores both get work.
    cap_n = min(512, Dp // 2) if Dp >= 256 else 512
    tn = _largest_tile(Dp, 128, cap_n)
    return Mp, tm, tn, tk


# ---------------------------------------------------------------------------
# Parameter preparation (do ONCE per forward pass, not per time step)
# ---------------------------------------------------------------------------
def prepare_params(W, b, *, compute_dtype=jnp.float32):
    """Mask the diagonal, transpose, pad to lane multiples, cast.

    Returns (Wt_p, b_p):
      Wt_p: (Dp, Dp) = pad((W * (ones - eye)).T), dtype = compute_dtype.
            Stored K-major so the kernel does a plain (tm,tk)x(tk,tn) dot
            with no per-tile transpose.
      b_p : (1, Dp) f32 bias (bias add stays in f32).
    """
    D = W.shape[0]
    Dp = _round_up(D, 128)
    mask = 1.0 - jnp.eye(D, dtype=W.dtype)           # ones - eye (zero diag)
    Wt = (W * mask).T                                 # (K=in, N=out)
    Wt_p = jnp.zeros((Dp, Dp), compute_dtype).at[:D, :D].set(
        Wt.astype(compute_dtype))
    b_p = jnp.zeros((1, Dp), jnp.float32).at[0, :D].set(
        b.reshape(D).astype(jnp.float32))
    return Wt_p, b_p


# ---------------------------------------------------------------------------
# Forward
# ---------------------------------------------------------------------------
def feature_regression(x, Wt_p, b_p):
    """z_h = x @ (W * (ones - eye)).T + b on the MXU.

    x: (B, D) input (B can be batch * time steps -- batch them!).
    Wt_p, b_p: prepared once via prepare_params().
    Output: (B, D), dtype = x.dtype.
    """
    B, D = x.shape
    Dp = Wt_p.shape[0]
    out_dtype = x.dtype
    compute_dtype = Wt_p.dtype

    Mp, tm, tn, tk = _choose_tiles(B, Dp)

    # Pad x (zeros contribute nothing to the contraction) and cast to the
    # storage/compute dtype BEFORE the pallas_call so the DMA moves the
    # narrow dtype.
    if (Mp, Dp) != (B, D) or x.dtype != compute_dtype:
        x_p = jnp.zeros((Mp, Dp), compute_dtype).at[:B, :D].set(
            x.astype(compute_dtype))
    else:
        x_p = x

    grid = (Mp // tm, Dp // tn, Dp // tk)

    in_specs = [
        pl.BlockSpec((tm, tk), lambda i, j, k: (i, k)),   # x
        pl.BlockSpec((tk, tn), lambda i, j, k: (k, j)),   # W.T (masked)
        pl.BlockSpec((1, tn), lambda i, j, k: (0, j)),    # bias
    ]
    out_specs = pl.BlockSpec((tm, tn), lambda i, j, k: (i, j))

    if out_dtype == jnp.float32:
        kernel = _fr_kernel_f32_out
        scratch_shapes = []
    else:
        kernel = _fr_kernel_acc
        scratch_shapes = [pltpu.VMEM((tm, tn), jnp.float32)]

    out = pl.pallas_call(
        kernel,
        out_shape=jax.ShapeDtypeStruct((Mp, Dp), out_dtype),
        grid_spec=pltpu.PrefetchScalarGridSpec(
            num_scalar_prefetch=0,
            grid=grid,
            in_specs=in_specs,
            out_specs=out_specs,
            scratch_shapes=scratch_shapes,
        ),
        compiler_params=pltpu.CompilerParams(
            dimension_semantics=("parallel", "parallel", "arbitrary"),
            vmem_limit_bytes=48 * 1024 * 1024,   # <= v7x's 64 MiB physical
        ),
    )(x_p, Wt_p, b_p)

    if (Mp, Dp) != (B, D):
        out = out[:B, :D]
    return out


def feature_regression_from_raw(x, W, b, *, compute_dtype=jnp.float32):
    """Convenience one-shot wrapper (prep is NOT amortized -- prefer
    prepare_params + feature_regression inside a time-step loop)."""
    Wt_p, b_p = prepare_params(W, b, compute_dtype=compute_dtype)
    return feature_regression(x, Wt_p, b_p)


# ---------------------------------------------------------------------------
# Parameter init (matches FeatureRegression.reset_parameters)
# ---------------------------------------------------------------------------
def init_params(key, input_size):
    stdv = 1.0 / math.sqrt(input_size)
    kw, kb = jax.random.split(key)
    W = jax.random.uniform(kw, (input_size, input_size), jnp.float32,
                           minval=-stdv, maxval=stdv)
    b = jax.random.uniform(kb, (input_size,), jnp.float32,
                           minval=-stdv, maxval=stdv)
    return W, b


def _reference(x, W, b):
    D = W.shape[0]
    m = jnp.ones((D, D), jnp.float32) - jnp.eye(D, dtype=jnp.float32)
    return x @ (W * m).T + b


if __name__ == "__main__":
    key = jax.random.PRNGKey(0)
    k_x, k_p, k_x2, k_p2 = jax.random.split(key, 4)

    # --- Small demo shape (B=8, D=32): grid collapses to (1,1,1). ----------
    batch, input_size = 8, 32
    x = jax.random.normal(k_x, (batch, input_size), jnp.float32)
    W, b = init_params(k_p, input_size)
    ref = _reference(x, W, b)

    # f32 storage/compute path (exact).
    Wt_p, b_p = prepare_params(W, b, compute_dtype=jnp.float32)
    z_h = jax.block_until_ready(feature_regression(x, Wt_p, b_p))
    assert z_h.shape == (batch, input_size)
    assert jnp.allclose(z_h, ref, atol=1e-5, rtol=1e-5)

    # bf16 storage path: W/x are cast in the wrapper BEFORE the pallas_call,
    # so HBM traffic for the dominant W stream really is halved; MXU
    # accumulation stays f32 and the output stays f32.
    Wt_bf, b_bf = prepare_params(W, b, compute_dtype=jnp.bfloat16)
    z_h_bf16 = jax.block_until_ready(feature_regression(x, Wt_bf, b_bf))
    assert z_h_bf16.shape == (batch, input_size)
    assert jnp.allclose(z_h_bf16, ref, atol=1e-1, rtol=1e-1)

    # --- Multi-tile shape (B=20, D=600 -> Dp=640, grid (1,5,5)): exercises
    # padding, K accumulation into the resident output block, and N tiling. --
    batch2, input_size2 = 20, 600
    x2 = jax.random.normal(k_x2, (batch2, input_size2), jnp.float32)
    W2, b2 = init_params(k_p2, input_size2)
    ref2 = _reference(x2, W2, b2)
    Wt2_p, b2_p = prepare_params(W2, b2, compute_dtype=jnp.float32)
    z2 = jax.block_until_ready(feature_regression(x2, Wt2_p, b2_p))
    assert z2.shape == (batch2, input_size2)
    assert jnp.allclose(z2, ref2, atol=1e-4, rtol=1e-4)

    print("KERNEL_OK")
</pallas_src>

<mosaic_0001>
module attributes {stable_mosaic.version = 11 : i64} {
  func.func @_fr_kernel_f32_out(%arg0: i32, %arg1: i32, %arg2: i32, %arg3: memref<8x128xf32, #tpu.memory_space<vmem>>, %arg4: memref<128x128xf32, #tpu.memory_space<vmem>>, %arg5: memref<1x128xf32, #tpu.memory_space<vmem>>, %arg6: memref<8x128xf32, #tpu.memory_space<vmem>>) attributes {dimension_semantics = [#tpu.dimension_semantics<parallel>, #tpu.dimension_semantics<parallel>, #tpu.dimension_semantics<arbitrary>], iteration_bounds = array<i64: 1, 1, 1>, scalar_prefetch = 0 : i64, scratch_operands = 0 : i64, tpu.core_type = #tpu.core_type<tc>, window_params = [{transform_indices = @transform_0, window_bounds = array<i64: 8, 128>}, {transform_indices = @transform_1, window_bounds = array<i64: 128, 128>}, {transform_indices = @transform_2, window_bounds = array<i64: 1, 128>}, {transform_indices = @transform_3, window_bounds = array<i64: 8, 128>}]} {
    %c0_i32 = arith.constant 0 : i32
    %0 = arith.cmpi eq, %arg2, %c0_i32 : i32
    %1 = arith.extui %0 : i1 to i32
    %c0_i32_0 = arith.constant 0 : i32
    %2 = arith.cmpi ne, %1, %c0_i32_0 : i32
    scf.if %2 {
      %cst_10 = arith.constant 0.000000e+00 : f32
      %12 = vector.broadcast %cst_10 : f32 to vector<8x128xf32>
      %c0_11 = arith.constant 0 : index
      %c0_12 = arith.constant 0 : index
      %13 = vector.load %arg6[%c0_11, %c0_12] : memref<8x128xf32, #tpu.memory_space<vmem>>, vector<8x128xf32>
      tpu.vector_store %arg6[%c0_11, %c0_12], %12 {strides = array<i32>} : memref<8x128xf32, #tpu.memory_space<vmem>>, vector<8x128xf32>,
    } else {
    }
    %c0 = arith.constant 0 : index
    %c0_1 = arith.constant 0 : index
    %3 = vector.load %arg6[%c0, %c0_1] : memref<8x128xf32, #tpu.memory_space<vmem>>, vector<8x128xf32>
    %c0_2 = arith.constant 0 : index
    %c0_3 = arith.constant 0 : index
    %4 = vector.load %arg3[%c0_2, %c0_3] : memref<8x128xf32, #tpu.memory_space<vmem>>, vector<8x128xf32>
    %c0_4 = arith.constant 0 : index
    %c0_5 = arith.constant 0 : index
    %5 = vector.load %arg4[%c0_4, %c0_5] : memref<128x128xf32, #tpu.memory_space<vmem>>, vector<128x128xf32>
    %cst = arith.constant dense<0.000000e+00> : vector<8x128xf32>
    %6 = tpu.matmul %4, %5, %cst {dimension_numbers = #tpu.dot_dimension_numbers<[1], [0], [0], [1], [0, 0, 1, 1], [], []>} : vector<8x128xf32>, vector<128x128xf32>, vector<8x128xf32> -> vector<8x128xf32>
    %7 = arith.addf %3, %6 : vector<8x128xf32>
    %c0_6 = arith.constant 0 : index
    %c0_7 = arith.constant 0 : index
    %8 = vector.load %arg6[%c0_6, %c0_7] : memref<8x128xf32, #tpu.memory_space<vmem>>, vector<8x128xf32>
    tpu.vector_store %arg6[%c0_6, %c0_7], %7 {strides = array<i32>} : memref<8x128xf32, #tpu.memory_space<vmem>>, vector<8x128xf32>,
    %c0_i32_8 = arith.constant 0 : i32
    %9 = arith.cmpi eq, %arg2, %c0_i32_8 : i32
    %10 = arith.extui %9 : i1 to i32
    %c0_i32_9 = arith.constant 0 : i32
    %11 = arith.cmpi ne, %10, %c0_i32_9 : i32
    scf.if %11 {
      %c0_10 = arith.constant 0 : index
      %c0_11 = arith.constant 0 : index
      %12 = vector.load %arg6[%c0_10, %c0_11] : memref<8x128xf32, #tpu.memory_space<vmem>>, vector<8x128xf32>
      %c0_12 = arith.constant 0 : index
      %c0_13 = arith.constant 0 : index
      %13 = vector.load %arg5[%c0_12, %c0_13] : memref<1x128xf32, #tpu.memory_space<vmem>>, vector<1x128xf32>
      %14 = vector.broadcast %13 : vector<1x128xf32> to vector<8x128xf32>
      %15 = arith.addf %12, %14 : vector<8x128xf32>
      %c0_14 = arith.constant 0 : index
      %c0_15 = arith.constant 0 : index
      %16 = vector.load %arg6[%c0_14, %c0_15] : memref<8x128xf32, #tpu.memory_space<vmem>>, vector<8x128xf32>
      tpu.vector_store %arg6[%c0_14, %c0_15], %15 {strides = array<i32>} : memref<8x128xf32, #tpu.memory_space<vmem>>, vector<8x128xf32>,
    } else {
    }
    return
  }
  func.func @transform_0(%arg0: i32, %arg1: i32, %arg2: i32) -> (i32, i32) {
    %c0_i32 = arith.constant 0 : i32
    return %arg0, %arg2 : i32, i32
  }
  func.func @transform_1(%arg0: i32, %arg1: i32, %arg2: i32) -> (i32, i32) {
    %c0_i32 = arith.constant 0 : i32
    return %arg2, %arg1 : i32, i32
  }
  func.func @transform_2(%arg0: i32, %arg1: i32, %arg2: i32) -> (i32, i32) {
    %c0_i32 = arith.constant 0 : i32
    %c0_i32_0 = arith.constant 0 : i32
    return %c0_i32, %arg1 : i32, i32
  }
  func.func @transform_3(%arg0: i32, %arg1: i32, %arg2: i32) -> (i32, i32) {
    %c0_i32 = arith.constant 0 : i32
    return %arg0, %arg1 : i32, i32
  }
}

</mosaic_0001>

<bundles_post_ra>
// kernel: tpu_custom_call.1
= control target key start
LH: loop header
LB: loop body
LE: loop exit
PB: predicated region body
PF: predicated region fallthrough
CT: control target
= control target key end

     0   :  { %8 = vsyncpa [#allocation3], 0  ;;  %s240_s0 = inlined_call_operand.hbm [shape: f32[8,128], index: 0, kind: input, shape index: {}]   ;;  %s241_s1 = inlined_call_operand.hbm [shape: f32[128,128], index: 1, kind: input, shape index: {}]   ;;  %s242_s2 = inlined_call_operand.vmem [shape: f32[1,128], index: 2, kind: input, shape index: {}]   ;;  %s243_s3 = inlined_call_operand.hbm [shape: f32[8,128], index: 3, kind: output, shape index: {}]  }
   0x1   :  { %9 = vsyncpa [#allocation6], 0 }
   0x2   :  { %10 = vsyncpa [#allocation4], 0  ;;  %s16_s14 = sshll.u32 %s240_s0, 4  ;;  %s203_s15 = smov [#allocation2]   ;;  %s17_s14 = int_to_ptr.hbm [resolvable:$true] %s16_s14 }
   0x3   :  { %s18_s16 = sshll.u32 %s203_s15, 4  ;;  %s26_s19 = sshll.u32 %s241_s1, 4  ;;  %s19_s16 = int_to_ptr.vmem [resolvable:$true] %s18_s16  ;;  %s27_s19 = int_to_ptr.hbm [resolvable:$true] %s26_s19 }
   0x4   :  { %21 = dma.hbm_to_vmem [thread:$0]  %s17_s14, 128, %s19_s16, [#allocation3]  }
   0x5   :  { %s204_s20 = smov [#allocation5]   ;;  %s205_s22 = smov 128  }
   0x6   :  { %s28_s21 = sshll.u32 %s204_s20, 4  ;;  %s206_s23 = smov 8   ;;  %s29_s21 = int_to_ptr.vmem [resolvable:$true] %s28_s21 }
   0x7   :  { %34 = dma.hbm_to_vmem [thread:$0]  %s27_s19, 2048, %s29_s21, [#allocation6], %s205_s22, %s205_s22, %s206_s23  }
   0x8   :  { %197 = dma.done.wait [#allocation3], 128  }
   0x9   :  { %198 = vsyncadd [#allocation3], 4294967168 }
   0xa   :  { %199 = dma.done.wait [#allocation6], 2048  }
   0xb   :  { %200 = vsyncadd [#allocation6], 4294965248  ;;  %v67_v0 = vld [vmem:[#allocation5 + $0x78] sm:$0xff]  ;;  %v66_v1 = vld [vmem:[#allocation5 + $0x70] sm:$0xff]  ;;  %s207_s24 = smov [#allocation7]   ;;  %s107_s28 = sshll.u32 %s243_s3, 4  ;;  %s108_s28 = int_to_ptr.hbm [resolvable:$true] %s107_s28 }
   0xc   :  { %68 = vmatpush.msra.mxu0 %v67_v0  ;;  %v65_v2 = vld [vmem:[#allocation5 + $0x68] sm:$0xff]  ;;  %v64_v3 = vld [vmem:[#allocation5 + $0x60] sm:$0xff]  ;;  %v63_v4 = vld [vmem:[#allocation5 + $0x58] sm:$0xff]  ;;  %s105_s25 = sshll.u32 %s207_s24, 4  ;;  %s106_s25 = int_to_ptr.vmem [resolvable:$true] %s105_s25 }
   0xd   :  { %v62_v5 = vld [vmem:[#allocation5 + $0x50] sm:$0xff]  ;;  %v61_v6 = vld [vmem:[#allocation5 + $0x48] sm:$0xff]  ;;  %v60_v7 = vld [vmem:[#allocation5 + $0x40] sm:$0xff] }
   0xe   :  { %69 = vmatpush.msra.mxu0 %v66_v1  ;;  %v59_v8 = vld [vmem:[#allocation5 + $0x38] sm:$0xff]  ;;  %v58_v9 = vld [vmem:[#allocation5 + $0x30] sm:$0xff]  ;;  %v57_v10 = vld [vmem:[#allocation5 + $0x28] sm:$0xff] }
   0xf   :  { %v56_v11 = vld [vmem:[#allocation5 + $0x20] sm:$0xff]  ;;  %v55_v12 = vld [vmem:[#allocation5 + $0x18] sm:$0xff]  ;;  %v54_v13 = vld [vmem:[#allocation5 + $0x10] sm:$0xff] }
  0x10   :  { %70 = vmatpush.msra.mxu0 %v65_v2  ;;  %v53_v14 = vld [vmem:[#allocation5 + $0x8] sm:$0xff]  ;;  %v52_v15 = vld [vmem:[#allocation5] sm:$0xff]  ;;  %v51_v16 = vld [vmem:[#allocation2] sm:$0xff] }
  0x11   :  { %v124_v17 = vld [vmem:[%s242_s2] ss:$0 sm:$0xff] }
  0x12   :  { %71 = vmatpush.msra.mxu0 %v64_v3 }
  0x14   :  { %72 = vmatpush.msra.mxu0 %v63_v4 }
  0x16   :  { %73 = vmatpush.msra.mxu0 %v62_v5 }
  0x18   :  { %74 = vmatpush.msra.mxu0 %v61_v6 }
  0x1a   :  { %75 = vmatpush.msra.mxu0 %v60_v7 }
  0x1c   :  { %76 = vmatpush.msra.mxu0 %v59_v8 }
  0x1e   :  { %77 = vmatpush.msra.mxu0 %v58_v9 }
  0x20   :  { %78 = vmatpush.msra.mxu0 %v57_v10 }
  0x22   :  { %79 = vmatpush.msra.mxu0 %v56_v11 }
  0x24   :  { %80 = vmatpush.msra.mxu0 %v55_v12 }
  0x26   :  { %81 = vmatpush.msra.mxu0 %v54_v13 }
  0x28   :  { %82 = vmatpush.msra.mxu0 %v53_v14 }
  0x2a   :  { %83 = vmatpush.msra.mxu0 %v52_v15 }
  0x2b   :  { %84 = vmatmul.f32.vlgmr.msra.gmra.mxu0 %v51_v16 }
  0xa8   :  { %v85_v18 = vpop.f32.mrf.mxu0 }
  0xa9   :  { %v98_v19 = vadd.f32 %v124_v17, %v85_v18 }
  0xab   :  { %99 = vst [vmem:[#allocation7] sm:$0xff] %v98_v19 }
  0xac   :  { %110 = dma.vmem_to_hbm [thread:$0]  %s106_s25, 128, %s108_s28, [#allocation4]  }
  0xad   :  { %201 = dma.done.wait [#allocation4], 128  }
  0xae   :  { %202 = vsyncadd [#allocation4], 4294967168 }
  0xaf   :  { %115 = vsyncpa [#allocation3], 1 }
  0xb0   :  { %116 = vsyncpa [#allocation6], 1 }
  0xb1   :  { %117 = vsyncpa [#allocation4], 1 }

</bundles_post_ra>
